<compile_context>
chip_gen: v7x
topology: tpu7x:2x2x1
jax: 0.10.0
libtpu: 0.0.40
codegen_flags: <defaults>
</compile_context>

<pallas_src>
import numpy as np
import jax
import jax.numpy as jnp
from jax.experimental import pallas as pl
from jax.experimental.pallas import tpu as pltpu


# ----------------------------- transform matrices ----------------------------
B_MAT = np.array([[1, 0, -1, 0],
                  [0, 1,  1, 0],
                  [0, -1, 1, 0],
                  [0, 1,  0, -1]], dtype=np.float32)
BT_MAT = B_MAT.T
G_MAT = np.array([[1.0,  0.0, 0.0],
                  [0.5,  0.5, 1.2],   # faithful to the reference (1.2, not 0.5)
                  [0.5, -0.5, 0.5],
                  [0.0,  0.0, 1.0]], dtype=np.float32)
GT_MAT = G_MAT.T
AT_MAT = np.array([[1, 1,  1,  0],
                   [0, 1, -1, -1]], dtype=np.float32)
A_MAT = AT_MAT.T

_SUB = 8     # sublane tile
_LANE = 128  # lane tile


def _pad2(a, rows, cols):
    out = np.zeros((rows, cols), np.float32)
    out[: a.shape[0], : a.shape[1]] = a
    return out


def _block_constants(C, W, T):
    """Compile-time block matrices implementing, as plain MXU matmuls:
       BD: overlapping 4x4 window extraction + right B-transform,
       GB: right G-transform, broadcast over the T output tiles,
       AR: channel reduction fused with the right A-transform.
    Column layout of the Winograd-domain arrays is c*4T + 4l + k
    (c = channel, l = output tile, k = frequency column)."""
    alpha, r, m = 4, 3, 2
    BD = np.zeros((C * W, C * 4 * T), np.float32)
    GB = np.zeros((C * r, C * 4 * T), np.float32)
    AR = np.zeros((C * 4 * T, m * T), np.float32)
    for c in range(C):
        for l in range(T):
            for k in range(alpha):
                col = c * 4 * T + 4 * l + k
                for w in range(alpha):
                    BD[c * W + 2 * l + w, col] = B_MAT[w, k]
                for s in range(r):
                    GB[c * r + s, col] = G_MAT[k, s]
                for b in range(m):
                    AR[col, m * l + b] = AT_MAT[b, k]   # A[k, b] = AT[b, k]
    return BD, GB, AR


# --------------------------------- the kernel --------------------------------
def _winograd_kernel(xs_ref, wr_ref, bt_ref, g_ref, at_ref,
                     bd_ref, gb_ref, ar_ref, y_ref):
    f32 = jnp.float32
    xs = xs_ref[...]          # (8,128): rows 0:4 = x[0, :, 0:4, :]  (lane = c*W+w)
    wr = wr_ref[...]          # (8,128): rows 0:3 = filters[0]       (lane = c*3+s)

    # Filter transform U_c = G w_c G^T, lane-dense over (c, l, k)  [MXU]
    w3 = jnp.dot(wr, gb_ref[...], preferred_element_type=f32)       # w_c G^T
    ubig = jnp.dot(g_ref[...], w3, preferred_element_type=f32)      # G w_c G^T

    # Data transform V_{c,l} = B^T X_{c,l} B; the overlapping window extraction
    # happens inside the block-diagonal constant matmul  [MXU]
    r1 = jnp.dot(bt_ref[...], xs, preferred_element_type=f32)       # B^T X_c
    vt = jnp.dot(r1, bd_ref[...], preferred_element_type=f32)       # B^T X_{c,l} B

    # Winograd Hadamard product  [VPU]
    h = vt * ubig

    # Channel reduction + inverse transform  [MXU]:
    #   M_l = sum_c U_c .* V_{c,l} ;  Y_l = A^T M_l A
    m2 = jnp.dot(h, ar_ref[...], preferred_element_type=f32)        # (M_l A)
    y_ref[...] = jnp.dot(at_ref[...], m2, preferred_element_type=f32)


# --------------------------------- wrapper ------------------------------------
def winograd2x3(x, filters):
    """Faithful forward of Winograd2x3.forward (which ignores its second arg and
    uses self.filters; `filters` here plays the role of self.filters)."""
    batch, C, H, W = x.shape
    F, Cf, r, _ = filters.shape
    assert Cf == C, "in_channels of filters must match input"
    assert r == 3 and H == W
    m = 2
    alpha = m + r - 1          # 4
    over = r - 1               # 2
    T = (W - alpha) // over + 1
    out_hw = H - r + 1
    # The reference Y loop indexes M[i, i*T*T + ...]; it only runs in-bounds when
    # num_filters <= batch_size, and only filter 0 / tile-row 0 is ever nonzero.
    assert F <= batch, "reference indexing requires num_filters <= batch_size"
    # Single-block kernel: everything must fit one (8,128) lane-dense tile.
    assert alpha <= _SUB and C * W <= _LANE and 4 * C * T <= _LANE and m * T <= _LANE

    BD, GB, AR = _block_constants(C, W, T)
    btj = jnp.asarray(_pad2(BT_MAT, _SUB, _SUB))
    g4j = jnp.asarray(_pad2(G_MAT, _SUB, _SUB))
    at2j = jnp.asarray(_pad2(AT_MAT, _SUB, _SUB))
    bdj = jnp.asarray(_pad2(BD, _LANE, _LANE))
    gbj = jnp.asarray(_pad2(GB, _LANE, _LANE))
    arj = jnp.asarray(_pad2(AR, _LANE, _LANE))

    # Only data that can reach the output enters the kernel: batch 0, input rows
    # 0:alpha, all channels; and filter 0.
    xs = jnp.transpose(x[0, :, 0:alpha, :], (1, 0, 2)).reshape(alpha, C * W)
    wr = jnp.transpose(filters[0], (1, 0, 2)).reshape(r, C * r)
    xs_p = jnp.zeros((_SUB, _LANE), jnp.float32).at[:alpha, : C * W].set(
        xs.astype(jnp.float32))
    wr_p = jnp.zeros((_SUB, _LANE), jnp.float32).at[:r, : C * r].set(
        wr.astype(jnp.float32))

    vmem = pl.BlockSpec(memory_space=pltpu.MemorySpace.VMEM)
    y_pad = pl.pallas_call(
        _winograd_kernel,
        out_shape=jax.ShapeDtypeStruct((_SUB, _LANE), jnp.float32),
        in_specs=[vmem] * 8,
        out_specs=vmem,
    )(xs_p, wr_p, btj, g4j, at2j, bdj, gbj, arj)

    y_strip = y_pad[:m, : m * T]                      # (2, 2T) nonzero output block

    # Reassemble the reference output: zeros everywhere except filter 0, output
    # rows 0:2, cols 0:2T; identical across the batch (reference broadcast).
    y = jnp.zeros((F, out_hw, out_hw), jnp.float32)
    y = y.at[0, 0:m, 0: m * T].set(y_strip)
    return jnp.broadcast_to(y[None], (batch, F, out_hw, out_hw))


# ------------------------ literal NumPy reference (check) ---------------------
def winograd2x3_reference(x, w):
    x = np.asarray(x, np.float32)
    w = np.asarray(w, np.float32)
    batch, C, H, W = x.shape
    F, _, r, _ = w.shape
    m = 2
    alpha = m + r - 1
    over = r - 1
    xin = np.transpose(x, (1, 0, 2, 3))
    T = (W - alpha) // over + 1
    P = batch * T * T
    U = np.zeros((F, C, alpha, alpha), np.float32)
    V = np.zeros((C, P, alpha, alpha), np.float32)
    for i in range(F):
        for j in range(C):
            U[i, j] = G_MAT @ w[i, j] @ GT_MAT
    for i in range(batch):
        for j in range(T):
            for k in range(T):
                for l in range(C):
                    b = i * T * T + j * T + k
                    V[l, b] = BT_MAT @ xin[l, i, j * over:j * over + alpha,
                                           k * over:k * over + alpha] @ B_MAT
    M = np.zeros((F, P, alpha, alpha), np.float32)
    for i in range(F):
        for j in range(T):
            for k in range(C):
                M[i, j] += U[i, k] * V[k, j]
    Y = np.zeros((F, batch, H - r + 1, H - r + 1), np.float32)
    for i in range(F):
        for j in range(batch):
            for k in range(T):
                for l in range(T):
                    b = i * T * T + k * T + l
                    Y[i, j, k * m:k * m + m, l * m:l * m + m] = AT_MAT @ M[i, b] @ A_MAT
    return np.transpose(Y, (1, 0, 2, 3))


if __name__ == "__main__":
    key = jax.random.PRNGKey(0)
    kx, kf = jax.random.split(key)
    batch, C, H, W = 4, 3, 8, 8
    F = 3
    x = jax.random.normal(kx, (batch, C, H, W), dtype=jnp.float32)
    # deterministic stand-in for torch.randint(-3, 3, (3, 3, 3, 3)) filters
    filt = jax.random.randint(kf, (F, C, 3, 3), -3, 3).astype(jnp.float32)

    y = winograd2x3(x, filt)
    y = jax.block_until_ready(y)

    y_ref = winograd2x3_reference(np.asarray(x), np.asarray(filt))
    assert y.shape == y_ref.shape == (batch, F, H - 2, H - 2)
    np.testing.assert_allclose(np.asarray(y), y_ref, rtol=1e-3, atol=1e-3)
    print("KERNEL_OK")
</pallas_src>

<mosaic_0001>
module attributes {stable_mosaic.version = 11 : i64} {
  func.func @_winograd_kernel(%arg0: memref<8x128xf32, #tpu.memory_space<vmem>>, %arg1: memref<8x128xf32, #tpu.memory_space<vmem>>, %arg2: memref<8x8xf32, #tpu.memory_space<vmem>>, %arg3: memref<8x8xf32, #tpu.memory_space<vmem>>, %arg4: memref<8x8xf32, #tpu.memory_space<vmem>>, %arg5: memref<128x128xf32, #tpu.memory_space<vmem>>, %arg6: memref<128x128xf32, #tpu.memory_space<vmem>>, %arg7: memref<128x128xf32, #tpu.memory_space<vmem>>, %arg8: memref<8x128xf32, #tpu.memory_space<vmem>>) attributes {dimension_semantics = [], scalar_prefetch = 0 : i64, scratch_operands = 0 : i64, tpu.core_type = #tpu.core_type<tc>} {
    %c0 = arith.constant 0 : index
    %c0_0 = arith.constant 0 : index
    %0 = vector.load %arg0[%c0, %c0_0] : memref<8x128xf32, #tpu.memory_space<vmem>>, vector<8x128xf32>
    %c0_1 = arith.constant 0 : index
    %c0_2 = arith.constant 0 : index
    %1 = vector.load %arg1[%c0_1, %c0_2] : memref<8x128xf32, #tpu.memory_space<vmem>>, vector<8x128xf32>
    %c0_3 = arith.constant 0 : index
    %c0_4 = arith.constant 0 : index
    %2 = vector.load %arg6[%c0_3, %c0_4] : memref<128x128xf32, #tpu.memory_space<vmem>>, vector<128x128xf32>
    %cst = arith.constant dense<0.000000e+00> : vector<8x128xf32>
    %3 = tpu.matmul %1, %2, %cst {dimension_numbers = #tpu.dot_dimension_numbers<[1], [0], [0], [1], [0, 0, 1, 1], [], []>} : vector<8x128xf32>, vector<128x128xf32>, vector<8x128xf32> -> vector<8x128xf32>
    %c0_5 = arith.constant 0 : index
    %c0_6 = arith.constant 0 : index
    %4 = vector.load %arg3[%c0_5, %c0_6] : memref<8x8xf32, #tpu.memory_space<vmem>>, vector<8x8xf32>
    %cst_7 = arith.constant dense<0.000000e+00> : vector<8x128xf32>
    %5 = tpu.matmul %4, %3, %cst_7 {dimension_numbers = #tpu.dot_dimension_numbers<[1], [0], [0], [1], [0, 0, 1, 1], [], []>} : vector<8x8xf32>, vector<8x128xf32>, vector<8x128xf32> -> vector<8x128xf32>
    %c0_8 = arith.constant 0 : index
    %c0_9 = arith.constant 0 : index
    %6 = vector.load %arg2[%c0_8, %c0_9] : memref<8x8xf32, #tpu.memory_space<vmem>>, vector<8x8xf32>
    %cst_10 = arith.constant dense<0.000000e+00> : vector<8x128xf32>
    %7 = tpu.matmul %6, %0, %cst_10 {dimension_numbers = #tpu.dot_dimension_numbers<[1], [0], [0], [1], [0, 0, 1, 1], [], []>} : vector<8x8xf32>, vector<8x128xf32>, vector<8x128xf32> -> vector<8x128xf32>
    %c0_11 = arith.constant 0 : index
    %c0_12 = arith.constant 0 : index
    %8 = vector.load %arg5[%c0_11, %c0_12] : memref<128x128xf32, #tpu.memory_space<vmem>>, vector<128x128xf32>
    %cst_13 = arith.constant dense<0.000000e+00> : vector<8x128xf32>
    %9 = tpu.matmul %7, %8, %cst_13 {dimension_numbers = #tpu.dot_dimension_numbers<[1], [0], [0], [1], [0, 0, 1, 1], [], []>} : vector<8x128xf32>, vector<128x128xf32>, vector<8x128xf32> -> vector<8x128xf32>
    %10 = arith.mulf %9, %5 : vector<8x128xf32>
    %c0_14 = arith.constant 0 : index
    %c0_15 = arith.constant 0 : index
    %11 = vector.load %arg7[%c0_14, %c0_15] : memref<128x128xf32, #tpu.memory_space<vmem>>, vector<128x128xf32>
    %cst_16 = arith.constant dense<0.000000e+00> : vector<8x128xf32>
    %12 = tpu.matmul %10, %11, %cst_16 {dimension_numbers = #tpu.dot_dimension_numbers<[1], [0], [0], [1], [0, 0, 1, 1], [], []>} : vector<8x128xf32>, vector<128x128xf32>, vector<8x128xf32> -> vector<8x128xf32>
    %c0_17 = arith.constant 0 : index
    %c0_18 = arith.constant 0 : index
    %13 = vector.load %arg4[%c0_17, %c0_18] : memref<8x8xf32, #tpu.memory_space<vmem>>, vector<8x8xf32>
    %cst_19 = arith.constant dense<0.000000e+00> : vector<8x128xf32>
    %14 = tpu.matmul %13, %12, %cst_19 {dimension_numbers = #tpu.dot_dimension_numbers<[1], [0], [0], [1], [0, 0, 1, 1], [], []>} : vector<8x8xf32>, vector<8x128xf32>, vector<8x128xf32> -> vector<8x128xf32>
    %c0_20 = arith.constant 0 : index
    %c0_21 = arith.constant 0 : index
    %15 = vector.load %arg8[%c0_20, %c0_21] : memref<8x128xf32, #tpu.memory_space<vmem>>, vector<8x128xf32>
    tpu.vector_store %arg8[%c0_20, %c0_21], %14 {strides = array<i32>} : memref<8x128xf32, #tpu.memory_space<vmem>>, vector<8x128xf32>,
    return
  }
}

</mosaic_0001>

<bundles_post_ra>
// kernel: tpu_custom_call.1
= control target key start
LH: loop header
LB: loop body
LE: loop exit
PB: predicated region body
PF: predicated region fallthrough
CT: control target
= control target key end

     0   :  { %13 = vsyncpa [#allocation3], 0  ;;  %s1286_s0 = inlined_call_operand.hbm [shape: f32[8,128], index: 0, kind: input, shape index: {}]   ;;  %s1287_s1 = inlined_call_operand.hbm [shape: f32[8,128], index: 1, kind: input, shape index: {}]   ;;  %s1288_s2 = inlined_call_operand.hbm [shape: f32[8,8], index: 2, kind: input, shape index: {}]   ;;  %s1289_s3 = inlined_call_operand.vmem [shape: f32[8,8], index: 3, kind: input, shape index: {}]   ;;  %s1290_s4 = inlined_call_operand.hbm [shape: f32[8,8], index: 4, kind: input, shape index: {}]   ;;  %s1291_s5 = inlined_call_operand.hbm [shape: f32[128,128], index: 5, kind: input, shape index: {}]   ;;  %s1292_s6 = inlined_call_operand.hbm [shape: f32[128,128], index: 6, kind: input, shape index: {}]   ;;  %s1293_s7 = inlined_call_operand.hbm [shape: f32[128,128], index: 7, kind: input, shape index: {}]   ;;  %s1294_s8 = inlined_call_operand.hbm [shape: f32[8,128], index: 8, kind: output, shape index: {}]  }
   0x1   :  { %14 = vsyncpa [#allocation6], 0 }
   0x2   :  { %15 = vsyncpa [#allocation9], 0 }
   0x3   :  { %16 = vsyncpa [#allocation12], 0 }
   0x4   :  { %17 = vsyncpa [#allocation4], 0  ;;  %s1071_s27 = smov [#allocation5]   ;;  %s1072_s29 = smov [#allocation8]  }
   0x5   :  { %s34_s28 = sshll.u32 %s1071_s27, 4  ;;  %s56_s30 = sshll.u32 %s1072_s29, 4  ;;  %s35_s28 = int_to_ptr.vmem [resolvable:$true] %s34_s28  ;;  %s57_s30 = int_to_ptr.vmem [resolvable:$true] %s56_s30 }
   0x6   :  { %s885_s11 = scalar_lea.hbm %s1287_s1, 128 }
   0x7   :  { %p886_p0 = scmp.ne.s32.totalorder %s1287_s1, %s885_s11  ;;  %p889_p1 = scmp.lt.u32.totalorder %s885_s11, %s1287_s1 }
   0x9   :  { %p891_p2 = pnand %p889_p1, %p886_p0 }
   0xb   :  { %894 = shalt.err (!%p891_p2)
}
   0xc   :  { %s895_s16 = scalar_lea.vmem %s35_s28, 128  ;;  %p900_p4 = scmp.lt.s32.totalorder %s35_s28, %s35_s28 }
   0xd   :  { %p896_p3 = scmp.ne.s32.totalorder %s35_s28, %s895_s16  ;;  %p901_p5 = scmp.lt.s32.totalorder %s895_s16, %s895_s16 }
   0xf   :  { %p902_p6 = por %p901_p5, %p900_p4 }
  0x11   :  { %p903_p7 = pnand %p902_p6, %p896_p3 }
  0x13   :  { %906 = shalt.err (!%p903_p7)
}
  0x14   :  { %37 = dma.hbm_to_vmem [thread:$0]  %s1287_s1, 128, %s35_s28, [#allocation6]  }
  0x15   :  { %s907_s21 = scalar_lea.hbm %s1290_s4, 128 }
  0x16   :  { %p908_p8 = scmp.ne.s32.totalorder %s1290_s4, %s907_s21  ;;  %p911_p9 = scmp.lt.u32.totalorder %s907_s21, %s1290_s4 }
  0x18   :  { %p913_p10 = pnand %p911_p9, %p908_p8 }
  0x1a   :  { %916 = shalt.err (!%p913_p10)
}
  0x1b   :  { %s917_s26 = scalar_lea.vmem %s57_s30, 128  ;;  %p922_p12 = scmp.lt.s32.totalorder %s57_s30, %s57_s30 }
  0x1c   :  { %p918_p11 = scmp.ne.s32.totalorder %s57_s30, %s917_s26  ;;  %p923_p13 = scmp.lt.s32.totalorder %s917_s26, %s917_s26 }
  0x1e   :  { %p924_p0 = por %p923_p13, %p922_p12 }
  0x20   :  { %p925_p1 = pnand %p924_p0, %p918_p11 }
  0x22   :  { %928 = shalt.err (!%p925_p1)
}
  0x23   :  { %59 = dma.hbm_to_vmem [thread:$0]  %s1290_s4, 128, %s57_s30, [#allocation9]  }
  0x24   :  { %s1073_s28 = smov [#allocation11]   ;;  %s1074_s9 = smov [#allocation2]  }
  0x25   :  { %s77_s29 = sshll.u32 %s1073_s28, 4  ;;  %s24_s10 = sshll.u32 %s1074_s9, 4  ;;  %s78_s29 = int_to_ptr.vmem [resolvable:$true] %s77_s29  ;;  %s25_s10 = int_to_ptr.vmem [resolvable:$true] %s24_s10 }
  0x26   :  { %s929_s13 = scalar_lea.hbm %s1292_s6, 2048 }
  0x27   :  { %p930_p2 = scmp.ne.s32.totalorder %s1292_s6, %s929_s13  ;;  %p933_p3 = scmp.lt.u32.totalorder %s929_s13, %s1292_s6 }
  0x29   :  { %p935_p4 = pnand %p933_p3, %p930_p2 }
  0x2b   :  { %938 = shalt.err (!%p935_p4)
}
  0x2c   :  { %s939_s4 = scalar_lea.vmem %s78_s29, 2048  ;;  %p944_p6 = scmp.lt.s32.totalorder %s78_s29, %s78_s29 }
  0x2d   :  { %p940_p5 = scmp.ne.s32.totalorder %s78_s29, %s939_s4  ;;  %p945_p7 = scmp.lt.s32.totalorder %s939_s4, %s939_s4 }
  0x2f   :  { %p946_p8 = por %p945_p7, %p944_p6 }
  0x31   :  { %p947_p9 = pnand %p946_p8, %p940_p5 }
  0x33   :  { %950 = shalt.err (!%p947_p9)
}
  0x34   :  { %s1075_s30 = smov 128   ;;  %s1076_s18 = smov 8  }
  0x35   :  { %83 = dma.hbm_to_vmem [thread:$0]  %s1292_s6, 2048, %s78_s29, [#allocation12], %s1075_s30, %s1075_s30, %s1076_s18  }
  0x36   :  { %s951_s23 = scalar_lea.hbm %s1286_s0, 128 }
  0x37   :  { %p952_p10 = scmp.ne.s32.totalorder %s1286_s0, %s951_s23  ;;  %p955_p11 = scmp.lt.u32.totalorder %s951_s23, %s1286_s0 }
  0x39   :  { %p957_p12 = pnand %p955_p11, %p952_p10 }
  0x3b   :  { %960 = shalt.err (!%p957_p12)
}
  0x3c   :  { %s961_s27 = scalar_lea.vmem %s25_s10, 128  ;;  %p966_p0 = scmp.lt.s32.totalorder %s25_s10, %s25_s10 }
  0x3d   :  { %p962_p13 = scmp.ne.s32.totalorder %s25_s10, %s961_s27  ;;  %p967_p1 = scmp.lt.s32.totalorder %s961_s27, %s961_s27 }
  0x3f   :  { %p968_p2 = por %p967_p1, %p966_p0 }
  0x41   :  { %p969_p3 = pnand %p968_p2, %p962_p13 }
  0x43   :  { %972 = shalt.err (!%p969_p3)
}
  0x44   :  { %27 = dma.hbm_to_vmem [thread:$0]  %s1286_s0, 128, %s25_s10, [#allocation3]  }
  0x45   :  { %s1077_s29 = smov [#allocation7]   ;;  %s1078_s11 = smov [#allocation10]  }
  0x46   :  { %s44_s9 = sshll.u32 %s1077_s29, 4  ;;  %s65_s12 = sshll.u32 %s1078_s11, 4  ;;  %s45_s9 = int_to_ptr.vmem [resolvable:$true] %s44_s9  ;;  %s1180_s12 = int_to_ptr.vmem [resolvable:$true] %s65_s12 }
  0x47   :  { %s973_s15 = scalar_lea.hbm %s1288_s2, 128 }
  0x48   :  { %p974_p4 = scmp.ne.s32.totalorder %s1288_s2, %s973_s15  ;;  %p977_p5 = scmp.lt.u32.totalorder %s973_s15, %s1288_s2 }
  0x4a   :  { %p979_p6 = pnand %p977_p5, %p974_p4 }
  0x4c   :  { %982 = shalt.err (!%p979_p6)
}
  0x4d   :  { %s983_s0 = scalar_lea.vmem %s45_s9, 128  ;;  %p988_p8 = scmp.lt.s32.totalorder %s45_s9, %s45_s9 }
  0x4e   :  { %p984_p7 = scmp.ne.s32.totalorder %s45_s9, %s983_s0  ;;  %p989_p9 = scmp.lt.s32.totalorder %s983_s0, %s983_s0 }
  0x50   :  { %p990_p10 = por %p989_p9, %p988_p8 }
  0x52   :  { %p991_p11 = pnand %p990_p10, %p984_p7 }
  0x54   :  { %994 = shalt.err (!%p991_p11)
}
  0x55   :  { %47 = dma.hbm_to_vmem [thread:$0]  %s1288_s2, 128, %s45_s9, [#allocation6]  }
  0x56   :  { %s995_s23 = scalar_lea.hbm %s1291_s5, 2048 }
  0x57   :  { %p996_p12 = scmp.ne.s32.totalorder %s1291_s5, %s995_s23  ;;  %p999_p13 = scmp.lt.u32.totalorder %s995_s23, %s1291_s5 }
  0x59   :  { %p1001_p0 = pnand %p999_p13, %p996_p12 }
  0x5b   :  { %1004 = shalt.err (!%p1001_p0)
}
  0x5c   :  { %s1005_s27 = scalar_lea.vmem %s1180_s12, 2048  ;;  %p1010_p2 = scmp.lt.s32.totalorder %s1180_s12, %s1180_s12 }
  0x5d   :  { %p1006_p1 = scmp.ne.s32.totalorder %s1180_s12, %s1005_s27  ;;  %p1011_p3 = scmp.lt.s32.totalorder %s1005_s27, %s1005_s27 }
  0x5f   :  { %p1012_p4 = por %p1011_p3, %p1010_p2 }
  0x61   :  { %p1013_p5 = pnand %p1012_p4, %p1006_p1 }
  0x63   :  { %1016 = shalt.err (!%p1013_p5)
}
  0x64   :  { %71 = dma.hbm_to_vmem [thread:$0]  %s1291_s5, 2048, %s1180_s12, [#allocation9], %s1075_s30, %s1075_s30, %s1076_s18  }
  0x65   :  { %s1079_s28 = smov [#allocation13]   ;;  %s1017_s13 = scalar_lea.hbm %s1293_s7, 2048 }
  0x66   :  { %s89_s29 = sshll.u32 %s1079_s28, 4  ;;  %p1018_p6 = scmp.ne.s32.totalorder %s1293_s7, %s1017_s13  ;;  %s90_s29 = int_to_ptr.vmem [resolvable:$true] %s89_s29 }
  0x67   :  { %p1021_p7 = scmp.lt.u32.totalorder %s1017_s13, %s1293_s7 }
  0x69   :  { %p1023_p8 = pnand %p1021_p7, %p1018_p6 }
  0x6b   :  { %1026 = shalt.err (!%p1023_p8)
}
  0x6c   :  { %s1027_s4 = scalar_lea.vmem %s90_s29, 2048  ;;  %p1032_p10 = scmp.lt.s32.totalorder %s90_s29, %s90_s29 }
  0x6d   :  { %p1028_p9 = scmp.ne.s32.totalorder %s90_s29, %s1027_s4  ;;  %p1033_p11 = scmp.lt.s32.totalorder %s1027_s4, %s1027_s4 }
  0x6f   :  { %p1034_p12 = por %p1033_p11, %p1032_p10 }
  0x71   :  { %p1035_p13 = pnand %p1034_p12, %p1028_p9 }
  0x73   :  { %1038 = shalt.err (!%p1035_p13)
}
  0x74   :  { %95 = dma.hbm_to_vmem [thread:$0]  %s1293_s7, 2048, %s90_s29, [#allocation12], %s1075_s30, %s1075_s30, %s1076_s18  }
  0x75   :  { %1061 = dma.done.wait [#allocation3], 128  }
  0x76   :  { %1062 = vsyncadd [#allocation3], 4294967168 }
  0x77   :  { %1063 = dma.done.wait [#allocation6], 256  }
  0x78   :  { %1064 = vsyncadd [#allocation6], 4294967040 }
  0x79   :  { %1065 = dma.done.wait [#allocation9], 2176  }
  0x7a   :  { %1066 = vsyncadd [#allocation9], 4294965120 }
  0x7b   :  { %1067 = dma.done.wait [#allocation12], 4096  }
  0x7c   :  { %1068 = vsyncadd [#allocation12], 4294963200  ;;  %v1080_v0 = vmov 0.0|0.0   ;;  %vm1081_vm0 = vmmov 0   ;;  %v1082_v1 = vmov 0.0   ;;  %v119_v2 = vld [vmem:[#allocation11] sm:$0xff] }
  0x7d   :  { %800 = vmatprep.subr.bf16.mxu0 %v1080_v0  ;;  %712 = vmatprep.mubr.msk.f32.mxu0 %vm1081_vm0, %v1082_v1  ;;  %v120_v3 = vld [vmem:[#allocation11 + $0x8] sm:$0xff]  ;;  %v121_v4 = vld [vmem:[#allocation11 + $0x10] sm:$0xff]  ;;  %v122_v6 = vld [vmem:[#allocation11 + $0x18] sm:$0xff]  ;;  %vm206_vm1 = vcmask 64512  }
  0x7e   :  { %715 = vmatprep.subr.mxu1 %v1082_v1  ;;  %717 = vmatprep.mubr.msk.f32.mxu1 %vm1081_vm0, %v1082_v1  ;;  %v801_v5 = vpack.c.bf16 %v120_v3, %v119_v2  ;;  %v804_v7 = vpack.c.bf16 %v122_v6, %v121_v4  ;;  %v123_v8 = vld [vmem:[#allocation11 + $0x20] sm:$0xff]  ;;  %v124_v9 = vld [vmem:[#allocation11 + $0x28] sm:$0xff]  ;;  %v125_v11 = vld [vmem:[#allocation11 + $0x30] sm:$0xff] }
  0x7f   :  { %v807_v10 = vpack.c.bf16 %v124_v9, %v123_v8  ;;  %v126_v12 = vld [vmem:[#allocation11 + $0x38] sm:$0xff]  ;;  %v127_v14 = vld [vmem:[#allocation11 + $0x40] sm:$0xff]  ;;  %v128_v15 = vld [vmem:[#allocation11 + $0x48] sm:$0xff] }
  0x80   :  { %802 = vmatpush3.bf16.msra.mxu0 %v801_v5  ;;  %v810_v13 = vpack.c.bf16 %v126_v12, %v125_v11  ;;  %v813_v16 = vpack.c.bf16 %v128_v15, %v127_v14  ;;  %v129_v17 = vld [vmem:[#allocation11 + $0x50] sm:$0xff]  ;;  %v130_v18 = vld [vmem:[#allocation11 + $0x58] sm:$0xff]  ;;  %v131_v20 = vld [vmem:[#allocation11 + $0x60] sm:$0xff] }
  0x81   :  { %803 = vmatprep.subr.bf16.mxu0 %v1080_v0  ;;  %v816_v19 = vpack.c.bf16 %v130_v18, %v129_v17  ;;  %v132_v21 = vld [vmem:[#allocation11 + $0x68] sm:$0xff]  ;;  %v133_v23 = vld [vmem:[#allocation11 + $0x70] sm:$0xff]  ;;  %v134_v24 = vld [vmem:[#allocation11 + $0x78] sm:$0xff] }
  0x82   :  { %v819_v22 = vpack.c.bf16 %v132_v21, %v131_v20  ;;  %v822_v25 = vpack.c.bf16 %v134_v24, %v133_v23  ;;  %v118_v26 = vld [vmem:[#allocation5] sm:$0xff]  ;;  %v205_v27 = vld [vmem:[%s1289_s3] sm:$0xff]  ;;  %v280_v33 = vld [vmem:[#allocation7] sm:$0xff]  ;;  %s1083_s3 = smov [#allocation14]  }
  0x83   :  { %v117_v29 = vld [vmem:[#allocation2] sm:$0xff]  ;;  %v355_v31 = vld [vmem:[#allocation10 + $0x8] sm:$0xff]  ;;  %v356_v35 = vld [vmem:[#allocation10 + $0x10] sm:$0xff]  ;;  %s608_s18 = sshll.u32 %s1083_s3, 4  ;;  %s609_s18 = int_to_ptr.vmem [resolvable:$true] %s608_s18 }
  0x84   :  { %805 = vmatpush3.bf16.msra.mxu0 %v804_v7  ;;  %v354_v30 = vld [vmem:[#allocation10] sm:$0xff]  ;;  %v357_v36 = vld [vmem:[#allocation10 + $0x18] sm:$0xff]  ;;  %v359_v39 = vld [vmem:[#allocation10 + $0x28] sm:$0xff]  ;;  %s1039_s19 = scalar_lea.vmem %s609_s18, 128  ;;  %p1044_p1 = scmp.lt.s32.totalorder %s609_s18, %s609_s18 }
  0x85   :  { %806 = vmatprep.subr.bf16.mxu0 %v1080_v0  ;;  %v825_v34 = vpack.c.bf16 %v355_v31, %v354_v30  ;;  %v828_v37 = vpack.c.bf16 %v357_v36, %v356_v35  ;;  %v358_v38 = vld [vmem:[#allocation10 + $0x20] sm:$0xff]  ;;  %v360_v41 = vld [vmem:[#allocation10 + $0x30] sm:$0xff]  ;;  %v361_v42 = vld [vmem:[#allocation10 + $0x38] sm:$0xff]  ;;  %p1040_p0 = scmp.ne.s32.totalorder %s609_s18, %s1039_s19  ;;  %p1045_p2 = scmp.lt.s32.totalorder %s1039_s19, %s1039_s19 }
  0x86   :  { %v831_v40 = vpack.c.bf16 %v359_v39, %v358_v38  ;;  %v834_v43 = vpack.c.bf16 %v361_v42, %v360_v41  ;;  %v362_v44 = vld [vmem:[#allocation10 + $0x40] sm:$0xff]  ;;  %v363_v45 = vld [vmem:[#allocation10 + $0x48] sm:$0xff]  ;;  %v364_v47 = vld [vmem:[#allocation10 + $0x50] sm:$0xff] }
  0x87   :  { %v837_v46 = vpack.c.bf16 %v363_v45, %v362_v44  ;;  %v365_v48 = vld [vmem:[#allocation10 + $0x58] sm:$0xff]  ;;  %v366_v50 = vld [vmem:[#allocation10 + $0x60] sm:$0xff]  ;;  %v367_v51 = vld [vmem:[#allocation10 + $0x68] sm:$0xff]  ;;  %p1046_p3 = por %p1045_p2, %p1044_p1 }
  0x88   :  { %808 = vmatpush3.bf16.msra.mxu0 %v807_v10  ;;  %v840_v49 = vpack.c.bf16 %v365_v48, %v364_v47  ;;  %v843_v52 = vpack.c.bf16 %v367_v51, %v366_v50  ;;  %v368_v53 = vld [vmem:[#allocation10 + $0x70] sm:$0xff]  ;;  %v369_v54 = vld [vmem:[#allocation10 + $0x78] sm:$0xff]  ;;  %v441_v56 = vld [vmem:[#allocation13] sm:$0xff] }
  0x89   :  { %809 = vmatprep.subr.bf16.mxu0 %v1080_v0  ;;  %v846_v55 = vpack.c.bf16 %v369_v54, %v368_v53  ;;  %v442_v57 = vld [vmem:[#allocation13 + $0x8] sm:$0xff]  ;;  %v443_v58 = vld [vmem:[#allocation13 + $0x10] sm:$0xff]  ;;  %v444_v60 = vld [vmem:[#allocation13 + $0x18] sm:$0xff]  ;;  %p1047_p4 = pnand %p1046_p3, %p1040_p0 }
  0x8a   :  { %v849_v59 = vpack.c.bf16 %v442_v57, %v441_v56  ;;  %v852_v61 = vpack.c.bf16 %v444_v60, %v443_v58  ;;  %v445_v62 = vld [vmem:[#allocation13 + $0x20] sm:$0xff]  ;;  %v446_v63 = vld [vmem:[#allocation13 + $0x28] sm:$0xff]  ;;  %v447_v3 = vld [vmem:[#allocation13 + $0x30] sm:$0xff] }
  0x8b   :  { %v855_v2 = vpack.c.bf16 %v446_v63, %v445_v62  ;;  %v448_v4 = vld [vmem:[#allocation13 + $0x38] sm:$0xff]  ;;  %v449_v6 = vld [vmem:[#allocation13 + $0x40] sm:$0xff]  ;;  %v450_v7 = vld [vmem:[#allocation13 + $0x48] sm:$0xff] }
  0x8c   :  { %811 = vmatpush3.bf16.msra.mxu0 %v810_v13  ;;  %v858_v5 = vpack.c.bf16 %v448_v4, %v447_v3  ;;  %v861_v8 = vpack.c.bf16 %v450_v7, %v449_v6  ;;  %v451_v9 = vld [vmem:[#allocation13 + $0x50] sm:$0xff]  ;;  %v452_v10 = vld [vmem:[#allocation13 + $0x58] sm:$0xff]  ;;  %v453_v12 = vld [vmem:[#allocation13 + $0x60] sm:$0xff] }
  0x8d   :  { %812 = vmatprep.subr.bf16.mxu0 %v1080_v0  ;;  %v864_v11 = vpack.c.bf16 %v452_v10, %v451_v9  ;;  %v454_v13 = vld [vmem:[#allocation13 + $0x68] sm:$0xff]  ;;  %v456_v20 = vld [vmem:[#allocation13 + $0x78] sm:$0xff] }
  0x8e   :  { %v867_v14 = vpack.c.bf16 %v454_v13, %v453_v12 }
  0x90   :  { %814 = vmatpush3.bf16.msra.mxu0 %v813_v16 }
  0x91   :  { %815 = vmatprep.subr.bf16.mxu0 %v1080_v0 }
  0x94   :  { %817 = vmatpush3.bf16.msra.mxu0 %v816_v19  ;;  %v455_v19 = vld [vmem:[#allocation13 + $0x70] sm:$0xff] }
  0x95   :  { %818 = vmatprep.subr.bf16.mxu0 %v1080_v0  ;;  %v870_v21 = vpack.c.bf16 %v456_v20, %v455_v19 }
  0x98   :  { %820 = vmatpush3.bf16.msra.mxu0 %v819_v22 }
  0x99   :  { %821 = vmatprep.subr.bf16.mxu0 %v1080_v0 }
  0x9c   :  { %823 = vmatpush3.bf16.msra.mxu0 %v822_v25  ;;  %v527_v25 = vld [vmem:[#allocation8] sm:$0xff] }
  0x9d   :  { %848 = vmatprep.subr.bf16.mxu0 %v1080_v0 }
  0x9f   :  { %713 = vmatmul.mubr.f32.vlgmr.msra.gmra.mrb[0].mxu0 %v118_v26 }
  0xa0   :  { %792 = vmatprep.mubr.msk.f32.mxu0 %vm1081_vm0, %v1082_v1  ;;  %850 = vmatpush3.bf16.msra.mxu0 %v849_v59 }
  0xa1   :  { %851 = vmatprep.subr.bf16.mxu0 %v1080_v0 }
  0xa4   :  { %853 = vmatpush3.bf16.msra.mxu0 %v852_v61 }
  0xa5   :  { %854 = vmatprep.subr.bf16.mxu0 %v1080_v0 }
  0xa8   :  { %856 = vmatpush3.bf16.msra.mxu0 %v855_v2 }
  0xa9   :  { %857 = vmatprep.subr.bf16.mxu0 %v1080_v0 }
  0xac   :  { %859 = vmatpush3.bf16.msra.mxu0 %v858_v5 }
  0xad   :  { %860 = vmatprep.subr.bf16.mxu0 %v1080_v0 }
  0xb0   :  { %862 = vmatpush3.bf16.msra.mxu0 %v861_v8 }
  0xb1   :  { %863 = vmatprep.subr.bf16.mxu0 %v1080_v0 }
  0xb4   :  { %865 = vmatpush3.bf16.msra.mxu0 %v864_v11 }
  0xb5   :  { %866 = vmatprep.subr.bf16.mxu0 %v1080_v0 }
  0xb8   :  { %868 = vmatpush3.bf16.msra.mxu0 %v867_v14 }
  0xb9   :  { %869 = vmatprep.subr.bf16.mxu0 %v1080_v0 }
  0xbc   :  { %871 = vmatpush3.bf16.msra.mxu0 %v870_v21 }
 0x172   :  { %v201_v28 = vpop.f32.mrb[0].mxu0 }
 0x173   :  { %v714_v32 = vpop.f32.mrb[1].mxu0  ;;  %716 = vmatpush3.msra.mxu1 %v201_v28 }
 0x174   :  { %718 = vmatmul.mubr.msk.f32.vlgmr.msra.gmra.mrb[0].mxu1 %vm206_vm1, %v205_v27  ;;  %720 = vmatprep.subr.mxu1 %v1082_v1 }
 0x175   :  { %721 = vmatpush3.msra.mxu1 %v117_v29  ;;  %722 = vmatprep.mubr.msk.f32.mxu1 %vm1081_vm0, %v1082_v1 }
 0x176   :  { %824 = vmatprep.subr.bf16.mxu1 %v1080_v0 }
 0x178   :  { %723 = vmatmul.mubr.msk.f32.vlgmr.msra.gmra.mrb[2].mxu1 %vm206_vm1, %v280_v33 }
 0x179   :  { %826 = vmatpush3.bf16.msra.mxu1 %v825_v34  ;;  %757 = vmatprep.mubr.msk.f32.mxu1 %vm1081_vm0, %v1082_v1 }
 0x17a   :  { %827 = vmatprep.subr.bf16.mxu1 %v1080_v0 }
 0x17d   :  { %829 = vmatpush3.bf16.msra.mxu1 %v828_v37 }
 0x17e   :  { %830 = vmatprep.subr.bf16.mxu1 %v1080_v0 }
 0x181   :  { %832 = vmatpush3.bf16.msra.mxu1 %v831_v40 }
 0x182   :  { %833 = vmatprep.subr.bf16.mxu1 %v1080_v0 }
 0x185   :  { %835 = vmatpush3.bf16.msra.mxu1 %v834_v43 }
 0x186   :  { %836 = vmatprep.subr.bf16.mxu1 %v1080_v0 }
 0x189   :  { %838 = vmatpush3.bf16.msra.mxu1 %v837_v46 }
 0x18a   :  { %839 = vmatprep.subr.bf16.mxu1 %v1080_v0 }
 0x18d   :  { %841 = vmatpush3.bf16.msra.mxu1 %v840_v49 }
 0x18e   :  { %842 = vmatprep.subr.bf16.mxu1 %v1080_v0 }
 0x191   :  { %844 = vmatpush3.bf16.msra.mxu1 %v843_v52 }
 0x192   :  { %845 = vmatprep.subr.bf16.mxu1 %v1080_v0 }
 0x195   :  { %847 = vmatpush3.bf16.msra.mxu1 %v846_v55 }
 0x196   :  { %795 = vmatprep.subr.mxu1 %v1082_v1 }
 0x247   :  { %v276_v15 = vpop.f32.mrb[0].mxu1 }
 0x248   :  { %v719_v16 = vpop.f32.mrb[1].mxu1 }
 0x24b   :  { %v350_v17 = vpop.f32.mrb[2].mxu1 }
 0x24c   :  { %v724_v18 = vpop.f32.mrb[3].mxu1  ;;  %758 = vmatmul.mubr.f32.vlgmr.msra.gmra.mrb[4].mxu1 %v350_v17 }
 0x24d   :  { %797 = vmatprep.mubr.msk.f32.mxu1 %vm1081_vm0, %v1082_v1 }
 0x31f   :  { %v436_v22 = vpop.f32.mrb[4].mxu1 }
 0x320   :  { %v440_v23 = vmul.f32 %v436_v22, %v276_v15  ;;  %v759_v24 = vpop.f32.mrb[5].mxu1 }
 0x322   :  { %793 = vmatmul.mubr.f32.vlgmr.msra.gmra.mrb[2].mxu0 %v440_v23 }
 0x3f5   :  { %v523_v26 = vpop.f32.mrb[2].mxu0 }
 0x3f6   :  { %v794_v27 = vpop.f32.mrb[3].mxu0  ;;  %796 = vmatpush3.msra.mxu1 %v523_v26 }
 0x3f7   :  { %798 = vmatmul.mubr.msk.f32.vlgmr.msra.gmra.mrb[6].mxu1 %vm206_vm1, %v527_v25 }
 0x4ca   :  { %v597_v0 = vpop.f32.mrb[6].mxu1 }
 0x4cb   :  { %601 = vst [vmem:[#allocation14] sm:$0xff] %v597_v0  ;;  %v799_v1 = vpop.f32.mrb[7].mxu1 }
 0x4cc   :  { %1050 = shalt.err (!%p1047_p4)
}
 0x4cd   :  { %s1051_s20 = scalar_lea.hbm %s1294_s8, 128 }
 0x4ce   :  { %p1052_p5 = scmp.ne.s32.totalorder %s1294_s8, %s1051_s20  ;;  %p1055_p6 = scmp.lt.u32.totalorder %s1051_s20, %s1294_s8 }
 0x4d0   :  { %p1057_p7 = pnand %p1055_p6, %p1052_p5 }
 0x4d2   :  { %1060 = shalt.err (!%p1057_p7)
}
 0x4d3   :  { %611 = dma.vmem_to_hbm [thread:$0]  %s609_s18, 128, %s1294_s8, [#allocation4]  }
 0x4d4   :  { %1069 = dma.done.wait [#allocation4], 128  }
 0x4d5   :  { %1070 = vsyncadd [#allocation4], 4294967168 }
 0x4d6   :  { %615 = vsyncpa [#allocation3], 1 }
 0x4d7   :  { %616 = vsyncpa [#allocation6], 1 }
 0x4d8   :  { %617 = vsyncpa [#allocation9], 1 }
 0x4d9   :  { %618 = vsyncpa [#allocation12], 1 }
 0x4da   :  { %619 = vsyncpa [#allocation4], 1 }

</bundles_post_ra>
